<compile_context>
chip_gen: v5e
topology: v5e:2x2
jax: 0.10.0
libtpu: 0.0.40
codegen_flags: <defaults>
</compile_context>

<pallas_src>
import jax
import jax.numpy as jnp
from jax.experimental import pallas as pl
from jax.experimental.pallas import tpu as pltpu  # noqa: F401  (kept for TPU backend import parity)


def _identity_noop_kernel(x_ref, o_ref):
    # Output buffer aliases the input buffer; there is nothing to compute and
    # nothing to move.  Leaving the body empty means zero DMA / zero VMEM use.
    del x_ref, o_ref


def identity(x):
    """Identity forward pass (returns x) implemented as a no-op Pallas call.

    The output aliases the input HBM buffer; the kernel issues no DMAs and
    performs no compute.  Wrap with jax.jit(..., donate_argnums=0) (see
    `identity_inplace`) to avoid XLA's defensive copy when x is donatable.
    """
    return pl.pallas_call(
        _identity_noop_kernel,
        out_shape=jax.ShapeDtypeStruct(x.shape, x.dtype),
        # Leave the array where it lives (HBM); no auto-DMA, no tiling.
        in_specs=[pl.BlockSpec(memory_space=pl.ANY)],
        out_specs=pl.BlockSpec(memory_space=pl.ANY),
        # Output is literally the input buffer.
        input_output_aliases={0: 0},
    )(x)


# Donated variant: guarantees the alias is honored without a defensive copy.
# Caller must not reuse `x` after this call (its buffer becomes the output).
identity_inplace = jax.jit(identity, donate_argnums=0)


# TODO(synk): forward_latency/_latency rely on external predict_latency /
# compute_latency helpers and are not part of the numerical forward pass.


if __name__ == "__main__":
    key = jax.random.PRNGKey(0)
    # NCHW, small shapes: batch=2, channels=4, spatial=16x16
    x = jax.random.normal(key, (2, 4, 16, 16), dtype=jnp.float32)

    # 1) Non-donated path (always safe; XLA may insert one defensive copy).
    y = identity(x)
    y = jax.block_until_ready(y)
    assert y.shape == x.shape
    assert y.dtype == x.dtype
    assert bool(jnp.all(y == x))

    # 2) Donated path (zero-copy alias).  Keep a host copy of x for checking,
    #    since x's device buffer is consumed by donation.
    x_host = jax.device_get(x)
    y2 = identity_inplace(x)
    y2 = jax.block_until_ready(y2)
    assert y2.shape == x_host.shape
    assert y2.dtype == x_host.dtype
    assert bool(jnp.all(y2 == x_host))

    print("KERNEL_OK")
</pallas_src>

<mosaic_0001>
module attributes {stable_mosaic.version = 11 : i64} {
  func.func @_identity_noop_kernel(%arg0: memref<2x4x16x16xf32, #tpu.memory_space<any>>, %arg1: memref<2x4x16x16xf32, #tpu.memory_space<any>>) attributes {dimension_semantics = [], scalar_prefetch = 0 : i64, scratch_operands = 0 : i64, tpu.core_type = #tpu.core_type<tc>} {
    return
  }
}

</mosaic_0001>

<bundles_post_ra>
// kernel: tpu_custom_call.1
= control target key start
LH: loop header
LB: loop body
LE: loop exit
PB: predicated region body
PF: predicated region fallthrough
CT: control target
= control target key end

     0   :  { %s16_s0 = inlined_call_operand.hbm [shape: f32[2,4,16,16], index: 0, kind: input, shape index: {}, may-alias: {0,1}]   ;;  %s17_s1 = inlined_call_operand.hbm [shape: f32[2,4,16,16], index: 1, kind: output, shape index: {}, may-alias: {0,1}]  }

</bundles_post_ra>
